<compile_context>
chip_gen: v7x
topology: tpu7x:2x2x1
jax: 0.10.0
libtpu: 0.0.40
codegen_flags: <defaults>
</compile_context>

<pallas_src>
import functools
import math

import jax
import jax.numpy as jnp
from jax.experimental import pallas as pl
from jax.experimental.pallas import tpu as pltpu


# ----------------------------- kernels --------------------------------------

def _sse_fused_kernel(x_ref, w1_ref, w2t_ref, o_ref, *, enlarge, inv_hw):
    """Single fused pass over a (Bt, C, HW) slab: pool -> FC -> sigmoid -> scale."""
    x = x_ref[...]                                            # (Bt, C, HW), I/O dtype
    # Global average pool with f32 accumulation.  HW is the true spatial extent
    # (no padding); Mosaic masks the partial lane vregs for us.
    pooled = jnp.sum(x.astype(jnp.float32), axis=-1) * inv_hw  # (Bt, C) f32

    # y1 = pooled @ W1^T : contract pooled's C with w1's C (both lane-dense in C).
    y1 = jax.lax.dot_general(
        pooled, w1_ref[...],
        dimension_numbers=(((1,), (1,)), ((), ())),
        preferred_element_type=jnp.float32)
    y1 = jnp.maximum(y1, 0.0)                                 # ReLU
    # y2 = y1 @ W2^T : w2t is Linear(Cr, C).weight transposed -> (Cr, C).
    y2 = jax.lax.dot_general(
        y1, w2t_ref[...],
        dimension_numbers=(((1,), (0,)), ((), ())),
        preferred_element_type=jnp.float32)

    scale = jax.nn.sigmoid(enlarge * y2).astype(x.dtype)      # (Bt, C)
    # Multiply in the I/O dtype; no full-slab f32 copy is kept live.
    o_ref[...] = x * scale[:, :, None]


def _sse_pool_kernel(x_ref, o_ref, *, hw, thw, inv_hw):
    """Fallback pass 1: pooled(b, c) = mean over HW, reduced over an 'arbitrary' axis."""
    j = pl.program_id(1)
    x = x_ref[...]                                            # (Bt, C, THW)
    xf = x.astype(jnp.float32)
    if hw % thw != 0:
        # Ragged last HW tile: zero the out-of-range lanes so the sum is exact.
        lane = jax.lax.broadcasted_iota(jnp.int32, x.shape, 2)
        xf = jnp.where(lane < (hw - j * thw), xf, 0.0)
    part = jnp.sum(xf, axis=-1)                               # (Bt, C) f32

    @pl.when(j == 0)
    def _():
        o_ref[...] = jnp.zeros_like(o_ref)

    o_ref[...] += part

    @pl.when(j == pl.num_programs(1) - 1)
    def _():
        o_ref[...] *= inv_hw


def _sse_scale_kernel(pooled_ref, w1_ref, w2t_ref, x_ref, o_ref, *, enlarge):
    """Fallback pass 2: recompute the tiny FC+sigmoid per block and scale x."""
    pooled = pooled_ref[...]                                  # (Bt, C) f32
    y1 = jax.lax.dot_general(
        pooled, w1_ref[...],
        dimension_numbers=(((1,), (1,)), ((), ())),
        preferred_element_type=jnp.float32)
    y1 = jnp.maximum(y1, 0.0)
    y2 = jax.lax.dot_general(
        y1, w2t_ref[...],
        dimension_numbers=(((1,), (0,)), ((), ())),
        preferred_element_type=jnp.float32)
    x = x_ref[...]                                            # (Bt, C, THW)
    scale = jax.nn.sigmoid(enlarge * y2).astype(x.dtype)      # (Bt, C)
    o_ref[...] = x * scale[:, :, None]


# ----------------------------- wrapper ---------------------------------------

def _vmem_budgets():
    """Return (per-step slab budget, vmem_limit clamp) for this TPU generation."""
    cap = 64 * 1024 * 1024
    try:
        info_cap = getattr(pltpu.get_tpu_info(), "vmem_capacity_bytes", None)
        if info_cap:
            cap = int(info_cap)
    except Exception:
        pass
    if cap >= 100 * 1024 * 1024:                 # v5e / v6e: 128 MiB physical VMEM
        return 40 * 1024 * 1024, 96 * 1024 * 1024
    # v7x (64 MiB per TensorCore) or unknown: stay well below physical capacity.
    return 20 * 1024 * 1024, 56 * 1024 * 1024


def sse_layer(x, w1, w2, enlarge=2, *, max_slab_bytes=None):
    """x: (B, C, H, W) NCHW.  w1: (Cr, C), w2: (C, Cr)  (PyTorch Linear weights)."""
    B, C, H, W = x.shape
    Cr = w1.shape[0]
    assert w1.shape == (Cr, C) and w2.shape == (C, Cr)

    HW = H * W
    inv_hw = 1.0 / HW
    enlarge = float(enlarge)

    # No padding: block last dim == full H*W, Mosaic masks partial lane vregs.
    x_flat = x.reshape(B, C, HW)
    # Keep the long C axis on lanes for BOTH weight operands.
    w2t = jnp.transpose(w2)                                   # (Cr, C)

    slab_budget, vmem_clamp = _vmem_budgets()
    if max_slab_bytes is not None:
        slab_budget = int(max_slab_bytes)

    itemsize = jnp.dtype(x.dtype).itemsize
    # Weights double-buffered with their real itemsize.  (pl.Buffered(1) would
    # shave one buffer each, but the win is ~KiB-scale so we keep the default.)
    w_bytes = 2 * (int(w1.size) + int(w2.size)) * jnp.dtype(w1.dtype).itemsize

    def fused_step_bytes(bt):
        b = 4 * bt * C * HW * itemsize                        # x in + out, double-buffered
        if itemsize < 4:
            b += bt * C * HW * 4                              # transient f32 upcast in the pool
        return b

    if fused_step_bytes(1) <= slab_budget:
        # ---------------- single fused pass (read x once, write once) --------
        bt_cap = 1
        while fused_step_bytes(bt_cap * 2) <= slab_budget:
            bt_cap *= 2
        if B >= 2:
            bt_cap = min(bt_cap, (B + 1) // 2)                # >=2 grid steps (both v7x TCs)
        Bt = max(1, min(bt_cap, B))
        grid_b = pl.cdiv(B, Bt)                               # ragged tail handled by Pallas

        footprint = fused_step_bytes(Bt) + w_bytes + 4 * Bt * C * 4
        vmem_limit = int(min(vmem_clamp,
                             max(32 * 1024 * 1024, footprint + (2 << 20))))

        out_flat = pl.pallas_call(
            functools.partial(_sse_fused_kernel, enlarge=enlarge, inv_hw=inv_hw),
            out_shape=jax.ShapeDtypeStruct((B, C, HW), x.dtype),
            grid_spec=pltpu.PrefetchScalarGridSpec(
                num_scalar_prefetch=0,
                grid=(grid_b,),
                in_specs=[
                    pl.BlockSpec((Bt, C, HW), lambda b: (b, 0, 0)),   # x slab
                    pl.BlockSpec((Cr, C), lambda b: (0, 0)),          # W1 (resident)
                    pl.BlockSpec((Cr, C), lambda b: (0, 0)),          # W2^T (resident)
                ],
                out_specs=pl.BlockSpec((Bt, C, HW), lambda b: (b, 0, 0)),
            ),
            compiler_params=pltpu.CompilerParams(
                dimension_semantics=("parallel",),
                vmem_limit_bytes=vmem_limit,
            ),
        )(x_flat, w1, w2t)
        return out_flat.reshape(B, C, H, W)

    # ---------------- two-pass fallback (per-batch slab too big for VMEM) ----
    # Pass 1: pool over an 'arbitrary' HW reduction axis into a (B, C) f32 array.
    # Pass 2: recompute the (tiny) FC + sigmoid per block and scale x.
    Bt = B if B < 8 else 8                                    # pooled block sublane-aligned
    thw_cap = max(1, slab_budget // (4 * C * itemsize))
    THW = min(HW, max(128, (thw_cap // 128) * 128))
    grid_b = pl.cdiv(B, Bt)
    n_hw = pl.cdiv(HW, THW)

    pool_fp = 2 * Bt * C * THW * itemsize + Bt * C * THW * 4 + 2 * Bt * C * 4
    scale_fp = 4 * Bt * C * THW * itemsize + w_bytes + 2 * Bt * C * 4
    vmem_limit = int(min(vmem_clamp,
                         max(32 * 1024 * 1024,
                             max(pool_fp, scale_fp) + (2 << 20))))

    pooled = pl.pallas_call(
        functools.partial(_sse_pool_kernel, hw=HW, thw=THW, inv_hw=inv_hw),
        out_shape=jax.ShapeDtypeStruct((B, C), jnp.float32),
        grid_spec=pltpu.PrefetchScalarGridSpec(
            num_scalar_prefetch=0,
            grid=(grid_b, n_hw),
            in_specs=[pl.BlockSpec((Bt, C, THW), lambda b, h: (b, 0, h))],
            out_specs=pl.BlockSpec((Bt, C), lambda b, h: (b, 0)),
        ),
        compiler_params=pltpu.CompilerParams(
            dimension_semantics=("parallel", "arbitrary"),
            vmem_limit_bytes=vmem_limit,
        ),
    )(x_flat)

    out_flat = pl.pallas_call(
        functools.partial(_sse_scale_kernel, enlarge=enlarge),
        out_shape=jax.ShapeDtypeStruct((B, C, HW), x.dtype),
        grid_spec=pltpu.PrefetchScalarGridSpec(
            num_scalar_prefetch=0,
            grid=(grid_b, n_hw),
            in_specs=[
                pl.BlockSpec((Bt, C), lambda b, h: (b, 0)),           # pooled
                pl.BlockSpec((Cr, C), lambda b, h: (0, 0)),           # W1
                pl.BlockSpec((Cr, C), lambda b, h: (0, 0)),           # W2^T
                pl.BlockSpec((Bt, C, THW), lambda b, h: (b, 0, h)),   # x tile
            ],
            out_specs=pl.BlockSpec((Bt, C, THW), lambda b, h: (b, 0, h)),
        ),
        compiler_params=pltpu.CompilerParams(
            dimension_semantics=("parallel", "parallel"),
            vmem_limit_bytes=vmem_limit,
        ),
    )(pooled, w1, w2t, x_flat)

    return out_flat.reshape(B, C, H, W)


def sse_layer_ref(x, w1, w2, enlarge=2):
    """Pure-JAX reference mirroring the PyTorch forward."""
    y = jnp.mean(x, axis=(2, 3))                 # avg_pool(1).view(b, c)
    y = y @ w1.T                                 # Linear(C, C//r, bias=False)
    y = jnp.maximum(y, 0.0)                      # ReLU
    y = y @ w2.T                                 # Linear(C//r, C, bias=False)
    y = jax.nn.sigmoid(enlarge * y)              # sigmoid(enlarge * y)
    return x * y[:, :, None, None]               # x * y.expand_as(x)


if __name__ == "__main__":
    # Shapes consistent with the module: channel=64, reduction=16 -> hidden=4.
    reduction, enlarge = 16, 2
    C = 64
    Cr = C // reduction

    key = jax.random.PRNGKey(0)
    kx1, kx2, k1, k2 = jax.random.split(key, 4)
    # PyTorch Linear weight shapes: (out_features, in_features).
    w1 = jax.random.normal(k1, (Cr, C), dtype=jnp.float32) * (1.0 / math.sqrt(C))
    w2 = jax.random.normal(k2, (C, Cr), dtype=jnp.float32) * (1.0 / math.sqrt(Cr))

    # Test 1: fused single-pass path, H*W NOT a multiple of 128 (masked lanes,
    # no wrapper pad/slice), batch grid has 2 steps.
    B, H, W = 2, 10, 10
    x = jax.random.normal(kx1, (B, C, H, W), dtype=jnp.float32)
    out = jax.block_until_ready(sse_layer(x, w1, w2, enlarge=enlarge))
    ref = sse_layer_ref(x, w1, w2, enlarge=enlarge)
    assert out.shape == (B, C, H, W)
    assert jnp.allclose(out, ref, atol=1e-5, rtol=1e-5), "fused path mismatch"

    # Test 2: force the two-pass HW-tiled fallback (tiny slab budget) so the
    # pool-reduction + scale kernels (ragged HW tile included) are verified too.
    B2, H2, W2 = 2, 20, 20
    x2 = jax.random.normal(kx2, (B2, C, H2, W2), dtype=jnp.float32)
    out2 = jax.block_until_ready(
        sse_layer(x2, w1, w2, enlarge=enlarge, max_slab_bytes=150_000))
    ref2 = sse_layer_ref(x2, w1, w2, enlarge=enlarge)
    assert out2.shape == (B2, C, H2, W2)
    assert jnp.allclose(out2, ref2, atol=1e-5, rtol=1e-5), "two-pass path mismatch"

    print("KERNEL_OK")
</pallas_src>

<mosaic_0001>
module attributes {stable_mosaic.version = 11 : i64} {
  func.func @_sse_fused_kernel(%arg0: i32, %arg1: memref<1x64x100xf32, #tpu.memory_space<vmem>>, %arg2: memref<4x64xf32, #tpu.memory_space<vmem>>, %arg3: memref<4x64xf32, #tpu.memory_space<vmem>>, %arg4: memref<1x64x100xf32, #tpu.memory_space<vmem>>) attributes {dimension_semantics = [#tpu.dimension_semantics<parallel>], iteration_bounds = array<i64: 2>, scalar_prefetch = 0 : i64, scratch_operands = 0 : i64, tpu.core_type = #tpu.core_type<tc>, window_params = [{transform_indices = @transform_0, window_bounds = array<i64: 1, 64, 100>}, {pipeline_mode = #tpu.pipeline_mode<synchronous>, transform_indices = @transform_1, window_bounds = array<i64: 4, 64>}, {pipeline_mode = #tpu.pipeline_mode<synchronous>, transform_indices = @transform_2, window_bounds = array<i64: 4, 64>}, {transform_indices = @transform_3, window_bounds = array<i64: 1, 64, 100>}]} {
    %c0 = arith.constant 0 : index
    %c0_0 = arith.constant 0 : index
    %c0_1 = arith.constant 0 : index
    %0 = vector.load %arg1[%c0, %c0_0, %c0_1] : memref<1x64x100xf32, #tpu.memory_space<vmem>>, vector<1x64x100xf32>
    %cst = arith.constant dense<0.000000e+00> : vector<1x64xf32>
    %1 = vector.multi_reduction <add>, %0, %cst [2] : vector<1x64x100xf32> to vector<1x64xf32>
    %cst_2 = arith.constant 0.00999999977 : f32
    %2 = vector.broadcast %cst_2 : f32 to vector<1x64xf32>
    %3 = arith.mulf %1, %2 : vector<1x64xf32>
    %c0_3 = arith.constant 0 : index
    %c0_4 = arith.constant 0 : index
    %4 = vector.load %arg2[%c0_3, %c0_4] : memref<4x64xf32, #tpu.memory_space<vmem>>, vector<4x64xf32>
    %cst_5 = arith.constant dense<0.000000e+00> : vector<1x4xf32>
    %5 = tpu.matmul %3, %4, %cst_5 {dimension_numbers = #tpu.dot_dimension_numbers<[1], [1], [0], [0], [0, 0, 1, 0], [], []>} : vector<1x64xf32>, vector<4x64xf32>, vector<1x4xf32> -> vector<1x4xf32>
    %cst_6 = arith.constant 0.000000e+00 : f32
    %6 = vector.broadcast %cst_6 : f32 to vector<1x4xf32>
    %7 = arith.maximumf %5, %6 : vector<1x4xf32>
    %c0_7 = arith.constant 0 : index
    %c0_8 = arith.constant 0 : index
    %8 = vector.load %arg3[%c0_7, %c0_8] : memref<4x64xf32, #tpu.memory_space<vmem>>, vector<4x64xf32>
    %cst_9 = arith.constant dense<0.000000e+00> : vector<1x64xf32>
    %9 = tpu.matmul %7, %8, %cst_9 {dimension_numbers = #tpu.dot_dimension_numbers<[1], [0], [0], [1], [0, 0, 1, 1], [], []>} : vector<1x4xf32>, vector<4x64xf32>, vector<1x64xf32> -> vector<1x64xf32>
    %cst_10 = arith.constant 2.000000e+00 : f32
    %10 = vector.broadcast %cst_10 : f32 to vector<1x64xf32>
    %11 = arith.mulf %10, %9 : vector<1x64xf32>
    %12 = arith.negf %11 : vector<1x64xf32>
    %13 = math.exp %12 : vector<1x64xf32>
    %cst_11 = arith.constant 1.000000e+00 : f32
    %14 = vector.broadcast %cst_11 : f32 to vector<1x64xf32>
    %15 = arith.addf %14, %13 : vector<1x64xf32>
    %16 = arith.divf %14, %15 : vector<1x64xf32>
    %17 = vector.shape_cast %16 : vector<1x64xf32> to vector<1x64x1xf32>
    %18 = vector.broadcast %17 : vector<1x64x1xf32> to vector<1x64x100xf32>
    %19 = arith.mulf %0, %18 : vector<1x64x100xf32>
    %c0_12 = arith.constant 0 : index
    %c0_13 = arith.constant 0 : index
    %c0_14 = arith.constant 0 : index
    %20 = vector.load %arg4[%c0_12, %c0_13, %c0_14] : memref<1x64x100xf32, #tpu.memory_space<vmem>>, vector<1x64x100xf32>
    tpu.vector_store %arg4[%c0_12, %c0_13, %c0_14], %19 {strides = array<i32>} : memref<1x64x100xf32, #tpu.memory_space<vmem>>, vector<1x64x100xf32>,
    return
  }
  func.func @transform_0(%arg0: i32) -> (i32, i32, i32) {
    %c0_i32 = arith.constant 0 : i32
    %c0_i32_0 = arith.constant 0 : i32
    %c0_i32_1 = arith.constant 0 : i32
    return %arg0, %c0_i32, %c0_i32_0 : i32, i32, i32
  }
  func.func @transform_1(%arg0: i32) -> (i32, i32) {
    %c0_i32 = arith.constant 0 : i32
    %c0_i32_0 = arith.constant 0 : i32
    %c0_i32_1 = arith.constant 0 : i32
    return %c0_i32, %c0_i32_0 : i32, i32
  }
  func.func @transform_2(%arg0: i32) -> (i32, i32) {
    %c0_i32 = arith.constant 0 : i32
    %c0_i32_0 = arith.constant 0 : i32
    %c0_i32_1 = arith.constant 0 : i32
    return %c0_i32, %c0_i32_0 : i32, i32
  }
  func.func @transform_3(%arg0: i32) -> (i32, i32, i32) {
    %c0_i32 = arith.constant 0 : i32
    %c0_i32_0 = arith.constant 0 : i32
    %c0_i32_1 = arith.constant 0 : i32
    return %arg0, %c0_i32, %c0_i32_0 : i32, i32, i32
  }
}

</mosaic_0001>

<bundles_post_ra>
// kernel: tpu_custom_call.1
= control target key start
LH: loop header
LB: loop body
LE: loop exit
PB: predicated region body
PF: predicated region fallthrough
CT: control target
= control target key end

     0   :  { %8 = vsyncpa [#allocation3], 0  ;;  %s1147_s0 = inlined_call_operand.hbm [shape: f32[2,64,100], index: 0, kind: input, shape index: {}]   ;;  %s1148_s1 = inlined_call_operand.hbm [shape: f32[4,64], index: 1, kind: input, shape index: {}]   ;;  %s1149_s2 = inlined_call_operand.vmem [shape: f32[4,64], index: 2, kind: input, shape index: {}]   ;;  %s1150_s3 = inlined_call_operand.hbm [shape: f32[2,64,100], index: 3, kind: output, shape index: {}]  }
   0x1   :  { %10 = vsyncpa [#allocation3 + $0x1], 0 }
   0x2   :  { %11 = vsyncpa [#allocation6], 0 }
   0x3   :  { %12 = vsyncpa [#allocation4], 0 }
   0x4   :  { %14 = vsyncpa [#allocation4 + $0x1], 0  ;;  %s881_s12 = smov 0   ;;  %s883_s13 = smov 0  }
   0x5   :  { %s885_s14 = smov 0   ;;  %s887_s15 = smov 0  }
   0x6 LB: > { %s902_s16 = sadd.s32 4294967295, %s850_s15   ;;  %s618_s17 = sadd.s32 4294967294, %s850_s15   ;;  %s850_s15 = sphi %s887_s15, %s1175_s15   ;;  %s846_s14 = sphi %s885_s14, %s1174_s14   ;;  %s842_s13 = sphi %s883_s13, %s1173_s13   ;;  %s838_s12 = sphi %s881_s12, %s1172_s12  }
   0x7   : > { %s906_s18 = sadd.s32 1, %s850_s15   ;;  %s27_s19 = sadd.s32 1, %s846_s14 }
   0x8   : > { %s24_s20 = ssub.s32 %s850_s15, %s906_s18  ;;  %p34_p0 = scmp.ne.s32.totalorder %s846_s14, %s842_s13 }
   0x9   : > { %p25_p1 = scmp.eq.s32.totalorder %s24_s20, 0  ;;  %p35_p2 = scmp.eq.s32.totalorder %s850_s15, 0 }
   0xa   : > { %p40_p3 = scmp.ne.s32.totalorder %s842_s13, %s838_s12  ;;  %p1151_p4 = scmp.eq.s32.totalorder %s902_s16, 0 }
   0xb   : > { %s918_s21 = scalar_select %p25_p1, %s846_s14, %s27_s19  }
   0xc   : > { %p920_p5 = por %p35_p2, %p34_p0  ;;  %p926_p6 = por %p1151_p4, %p40_p3 }
   0xd   : > { %p106_p7 = scmp.eq.s32.totalorder %s902_s16, 1  ;;  %p112_p8 = scmp.eq.s32.totalorder %s618_s17, 1 }
   0xe   : > { %s1157_s23 = scalar_select %p926_p6, 1, 0 }
   0xf   : > { %p619_p9 = scmp.ge.s32.totalorder %s850_s15, 1  ;;  %p119_p10 = scmp.lt.s32.totalorder %s850_s15, 3 }
  0x10   : > { %p933_p11 = por %p106_p7, %p34_p0  ;;  %p937_p12 = por %p112_p8, %p40_p3 }
  0x11   : > { %p941_p13 = pnand %p619_p9, %p119_p10  ;;  %s852_s27 = smov [#allocation5]  }
  0x12   : > { %s1158_s24 = scalar_select %p933_p11, 1, 0 }
  0x13   : > { %s1159_s25 = scalar_select %p937_p12, 1, 0 }
  0x14   : > { %s1160_s26 = scalar_select %p941_p13, 1, 0 }
  0x15   : > { %p663_p2 = pneg %p941_p13  ;;  %s132_s28 = sshll.u32 %s852_s27, 4  ;;  %s133_s28 = int_to_ptr.vmem [resolvable:$true] %s132_s28 }
  0x16   : > { %p676_p4 = scmp.lt.s32.totalorder %s850_s15, 2  ;;  %p1161_p0 = scmp.eq.s32.totalorder %s902_s16, 0 }
  0x17   : > { %s146_s30 = sand.u32 1, %s846_s14   ;;  %s722_s8 = scalar_lea.hbm %s1148_s1, 64 }
  0x18   : > { %p951_p7 = pnand %p663_p2, %p1161_p0  ;;  %p958_p3 = pnand %p676_p4, %p920_p5 }
  0x19   : > { %s622_s5 = sshll.u32 %s146_s30, 6  ;;  %p723_p8 = scmp.ne.s32.totalorder %s1148_s1, %s722_s8 }
  0x1a   : > { %s1163_s4 = scalar_select %p958_p3, 1, 0 }
  0x1b   : > { %p724_p9 = pneg %p951_p7  ;;  %p729_p4 = scmp.lt.u32.totalorder %s722_s8, %s1148_s1 }
  0x1d   : > { %p725_p10 = pnand %p724_p9, %p723_p8 }
  0x1f   : > { %p726_p2 = pneg %p725_p10 }
  0x21   : > { %p731_p5 = pnand %p729_p4, %p726_p2 }
  0x23   : > { %734 = shalt.err (!%p731_p5)
}
  0x24   : > { %s735_s19 = scalar_lea.vmem %s133_s28, 64  ;;  %p743_p11 = scmp.lt.s32.totalorder %s133_s28, %s133_s28 }
  0x25   : > { %p736_p0 = scmp.ne.s32.totalorder %s133_s28, %s735_s19  ;;  %p744_p6 = scmp.lt.s32.totalorder %s735_s19, %s735_s19 }
  0x27   : > { %p738_p1 = pnand %p736_p0, %p724_p9  ;;  %p745_p13 = por %p744_p6, %p743_p11 }
  0x29   : > { %p739_p12 = pneg %p738_p1 }
  0x2b   : > { %p746_p3 = pnand %p745_p13, %p739_p12 }
  0x2d   : > { %749 = shalt.err (!%p746_p3)
}
  0x2e   : > { %666 = dma.hbm_to_vmem [thread:$0]  (!%p951_p7), %s1148_s1, 64, %s133_s28, [#allocation6]  }
  0x2f   : > { %s639_s27 = sshll.u32 %s850_s15, 10  ;;  %s150_s6 = scalar_lea.vmem [#allocation2], %s622_s5 }
  0x30   : > { %s157_s7 = sshll.u32 %s150_s6, 4  ;;  %s982_s10 = scalar_lea.hbm %s1147_s0, %s639_s27  ;;  %s984_s7 = int_to_ptr.vmem [resolvable:$true] %s157_s7 }
  0x31   : > { %s986_s29 = scalar_lea.sflag [#allocation3], %s146_s30  ;;  %s750_s11 = scalar_lea.hbm %s982_s10, 1024 }
  0x32   : > { %p751_p6 = scmp.ne.s32.totalorder %s982_s10, %s750_s11  ;;  %p1164_p11 = scmp.ne.s32.totalorder %s1163_s4, 0 }
  0x33   : > { %s755_s17 = scalar_lea.hbm %s1147_s0, 2048  ;;  %p756_p7 = scmp.lt.u32.totalorder %s982_s10, %s1147_s0 }
  0x34   : > { %p752_p12 = pneg %p1164_p11  ;;  %p757_p3 = scmp.lt.u32.totalorder %s755_s17, %s750_s11 }
  0x35   : > { %p759_p9 = scmp.lt.u32.totalorder %s750_s11, %s982_s10 }
  0x36   : > { %p753_p13 = pnand %p752_p12, %p751_p6  ;;  %p758_p8 = por %p757_p3, %p756_p7 }
  0x38   : > { %p754_p1 = pneg %p753_p13  ;;  %p760_p10 = por %p759_p9, %p758_p8 }
  0x3a   : > { %p761_p2 = pnand %p760_p10, %p754_p1 }
  0x3c   : > { %764 = shalt.err (!%p761_p2)
}
  0x3d   : > { %s765_s30 = scalar_lea.vmem %s984_s7, 1024  ;;  %s853_s22 = smov [#allocation2]  }
  0x3e   : > { %p766_p4 = scmp.ne.s32.totalorder %s984_s7, %s765_s30  ;;  %s770_s27 = sshll.u32 %s853_s22, 4  ;;  %s771_s27 = int_to_ptr.vmem [resolvable:$false] %s770_s27 }
  0x3f   : > { %s772_s6 = scalar_lea.vmem %s771_s27, 2048  ;;  %p773_p6 = scmp.lt.s32.totalorder %s984_s7, %s771_s27 }
  0x40   : > { %p768_p5 = pnand %p766_p4, %p752_p12  ;;  %p774_p13 = scmp.lt.s32.totalorder %s772_s6, %s765_s30 }
  0x42   : > { %p769_p0 = pneg %p768_p5  ;;  %p775_p7 = por %p774_p13, %p773_p6 }
  0x44   : > { %p776_p3 = pnand %p775_p7, %p769_p0 }
  0x46   : > { %779 = shalt.err (!%p776_p3)
}
  0x47   : > { %s854_s8 = smov 128   ;;  %s855_s9 = smov 8  }
  0x48   : > { %670 = dma.hbm_to_vmem [thread:$0]  (!%p1164_p11), %s982_s10, 1024, %s984_s7, %s986_s29, %s854_s8, %s854_s8, %s855_s9  }
  0x49   : > { %p1165_p12 = scmp.ne.s32.totalorder %s1160_s26, 0 }
  0x4a   : > { %s1017_s11 = sand.u32 (!%p1165_p12), 1, %s842_s13   ;;  %p1166_p1 = scmp.ne.s32.totalorder (!%p1165_p12), %s1157_s23, 0 }
  0x4b   : > { %169 = sbr.rel (%p1165_p12) target bundleno = 852 (0x354), region = 32  ;;  %s626_s28 = sshll.u32 (!%p1165_p12), %s1017_s11, 6 }
  0x4c   : > { %s172_s5 = scalar_lea.sflag (!%p1165_p12), [#allocation3], %s1017_s11  ;;  %s175_s17 = scalar_lea.vmem (!%p1165_p12), [#allocation2], %s626_s28 }
  0x52   : > { %825 = dma.done.wait (%p1166_p1), %s172_s5, 1024  }
  0x53   : > { %827 = vsyncadd (%p1166_p1), %s172_s5, 4294966272  ;;  %p1167_p11 = scmp.eq.s32.totalorder %s902_s16, 0 }
  0x55   : > { %829 = dma.done.wait (%p1167_p11), [#allocation6], 64   ;;  %p1168_p8 = pmov %p1167_p11 }
  0x56   : > { %vm210_vm0 = vcmask 818176   ;;  %v1031_v0 = vld [vmem:[%s175_s17] sm:$0xff]  ;;  %v1033_v1 = vld [vmem:[%s175_s17 + $0x10] sm:$0xff]  ;;  %v1035_v2 = vld [vmem:[%s175_s17 + $0x8] sm:$0xff]  ;;  %v856_v16 = vmov 0.0   ;;  %vm307_vm1 = vcmask 523264   ;;  %v252_v18 = vlaneseq }
  0x57   : > { %831 = vsyncadd (%p1168_p8), [#allocation6], 4294967232  ;;  %v211_v3 = vsel %vm210_vm0, %v1031_v0, 0.0  ;;  %v217_v4 = vsel %vm210_vm0, %v1033_v1, 0.0  ;;  %v1041_v5 = vld [vmem:[%s175_s17 + $0x18] sm:$0xff]  ;;  %v214_v6 = vsel %vm210_vm0, %v1035_v2, 0.0  ;;  %645 = vmatprep.subr.mxu0 %v856_v16  ;;  %650 = vmatprep.subr.mxu1 %v856_v16 }
  0x58   : > { %212 = vadd.xlane.f32.xlu0 %v211_v3  ;;  %218 = vadd.xlane.f32.xlu1 %v217_v4  ;;  %v220_v7 = vsel %vm210_vm0, %v1041_v5, 0.0  ;;  %v1047_v8 = vld [vmem:[%s175_s17 + $0x20] sm:$0xff]  ;;  %v1049_v9 = vld [vmem:[%s175_s17 + $0x28] sm:$0xff]  ;;  %v1055_v12 = vld [vmem:[%s175_s17 + $0x30] sm:$0xff]  ;;  %vm857_vm2 = vmmov 0   ;;  %v253_v19 = vand.u32 127, %v252_v18 }
  0x59   : > { %v223_v10 = vsel %vm210_vm0, %v1047_v8, 0.0  ;;  %v226_v11 = vsel %vm210_vm0, %v1049_v9, 0.0  ;;  %v1057_v13 = vld [vmem:[%s175_s17 + $0x38] sm:$0xff]  ;;  %v229_v14 = vsel %vm210_vm0, %v1055_v12, 0.0  ;;  %v243_v17 = vld [vmem:[#allocation5] sm:$0xf]  ;;  %647 = vmatprep.mubr.msk.f32.mxu0 %vm857_vm2, %v856_v16  ;;  %652 = vmatprep.mubr.msk.f32.mxu1 %vm857_vm2, %v856_v16 }
  0x5a   : > { %v232_v15 = vsel %vm210_vm0, %v1057_v13, 0.0  ;;  %646 = vmatpush3.xpose.msk.msra.mxu0 %vm307_vm1, %v243_v17  ;;  %v1064_v20 = vshrl.u32 %v252_v18, 7  ;;  %v258_v21 = vadd.s32 4294967288, %v253_v19  ;;  %v272_v22 = vadd.s32 4294967272, %v253_v19  ;;  %s201_s4 = scalar_lea.vmem [#allocation7], %s626_s28  ;;  %s640_s7 = sshll.u32 %s902_s16, 10 }
  0x5b   : > { %v265_v24 = vadd.s32 4294967280, %v253_v19  ;;  %v279_v26 = vadd.s32 4294967264, %v253_v19  ;;  %v286_v35 = vadd.s32 4294967256, %v253_v19  ;;  %vm263_vm3 = vcmask 130112   ;;  %s535_s10 = sshll.u32 %s201_s4, 4  ;;  %s1099_s20 = scalar_lea.hbm %s1150_s3, %s640_s7  ;;  %s1101_s10 = int_to_ptr.vmem [resolvable:$true] %s535_s10 }
  0x5c   : > { %215 = vadd.xlane.f32.xlu0 %v214_v6  ;;  %221 = vadd.xlane.f32.xlu1 %v220_v7  ;;  %v256_v27 = vsub.s32 %v253_v19, %v1064_v20  ;;  %v261_v29 = vsub.s32 %v258_v21, %v1064_v20  ;;  %v275_v30 = vsub.s32 %v272_v22, %v1064_v20  ;;  %vm270_vm4 = vcmask 195712   ;;  %v384_v7 = vld [vmem:[%s1149_s2] sm:$0xf]  ;;  %s522_s30 = scalar_lea.sflag [#allocation4], %s1017_s11  ;;  %s780_s16 = scalar_lea.vmem %s1101_s10, 1024 }
  0x5d   : > { %v268_v31 = vsub.s32 %v265_v24, %v1064_v20  ;;  %v282_v38 = vsub.s32 %v279_v26, %v1064_v20  ;;  %v293_v39 = vadd.s32 4294967248, %v253_v19  ;;  %v300_v43 = vadd.s32 4294967240, %v253_v19  ;;  %p781_p9 = scmp.ne.s32.totalorder %s1101_s10, %s780_s16  ;;  %p1169_p10 = scmp.ne.s32.totalorder %s1158_s24, 0 }
  0x5e   : > { %vm277_vm5 = vcmask 261312   ;;  %v289_v46 = vsub.s32 %v286_v35, %v1064_v20  ;;  %vm284_vm6 = vcmask 326912   ;;  %vm291_vm7 = vcmask 392512   ;;  %s858_s22 = smov [#allocation7]  }
  0x5f   : > { %v296_v54 = vsub.s32 %v293_v39, %v1064_v20  ;;  %v303_v55 = vsub.s32 %v300_v43, %v1064_v20  ;;  %vm298_vm8 = vcmask 458112   ;;  %vm305_vm9 = vcmask 523712   ;;  %p782_p2 = pnand %p781_p9, %p1169_p10  ;;  %s784_s27 = sshll.u32 %s858_s22, 4  ;;  %s785_s27 = int_to_ptr.vmem [resolvable:$false] %s784_s27 }
  0x60   : > { %224 = vadd.xlane.f32.xlu0 %v223_v10  ;;  %227 = vadd.xlane.f32.xlu1 %v226_v11  ;;  %vm389_vm10 = vcmask 1043456   ;;  %vm385_vm11 = vcmask 31744   ;;  %v472_v22 = vsub.s32 0, %v1064_v20  ;;  %s786_s6 = scalar_lea.vmem %s785_s27, 2048  ;;  %p787_p5 = scmp.lt.s32.totalorder %s1101_s10, %s785_s27 }
  0x61   : > { %651 = vmatpush3.msk.msra.mxu1 %vm389_vm10, %v384_v7  ;;  %p783_p4 = pneg %p782_p2  ;;  %p788_p0 = scmp.lt.s32.totalorder %s786_s6, %s780_s16 }
  0x63   : > { %p789_p6 = por %p788_p0, %p787_p5 }
  0x64   : > { %230 = vadd.xlane.f32.xlu0 %v229_v14  ;;  %233 = vadd.xlane.f32.xlu1 %v232_v15 }
  0x65   : > { %p790_p13 = pnand %p789_p6, %p783_p4 }
  0xe5   : > { %v213_v23 = vpop.xlane.xlu0 %212  ;;  %v219_v25 = vpop.xlane.xlu1 %218 }
  0xe6   : > { %v235_v28 = vmul.f32 0.01, %v213_v23  ;;  %v237_v32 = vmul.f32 0.01, %v219_v25 }
  0xe8   : > { %v257_v40 = vrot.slane %v235_v28, %v256_v27  ;;  %v269_v44 = vrot.slane %v237_v32, %v268_v31 }
  0xe9   : > { %v216_v33 = vpop.xlane.xlu0 %215  ;;  %v222_v34 = vpop.xlane.xlu1 %221 }
  0xea   : > { %v236_v36 = vmul.f32 0.01, %v216_v33  ;;  %v238_v37 = vmul.f32 0.01, %v222_v34 }
  0xec   : > { %v262_v41 = vrot.slane %v236_v36, %v261_v29  ;;  %v276_v42 = vrot.slane %v238_v37, %v275_v30 }
  0xed   : > { %v225_v45 = vpop.xlane.xlu0 %224  ;;  %v228_v47 = vpop.xlane.xlu1 %227 }
  0xee   : > { %v264_v48 = vsel %vm263_vm3, %v262_v41, %v257_v40  ;;  %v239_v49 = vmul.f32 0.01, %v225_v45  ;;  %v240_v50 = vmul.f32 0.01, %v228_v47 }
  0xef   : > { %v271_v51 = vsel %vm270_vm4, %v269_v44, %v264_v48 }
  0xf0   : > { %v278_v52 = vsel %vm277_vm5, %v276_v42, %v271_v51  ;;  %v283_v53 = vrot.slane %v239_v49, %v282_v38  ;;  %v290_v56 = vrot.slane %v240_v50, %v289_v46 }
  0xf1   : > { %v231_v57 = vpop.xlane.xlu0 %230  ;;  %v234_v58 = vpop.xlane.xlu1 %233 }
  0xf2   : > { %v285_v59 = vsel %vm284_vm6, %v283_v53, %v278_v52  ;;  %v241_v60 = vmul.f32 0.01, %v231_v57  ;;  %v242_v61 = vmul.f32 0.01, %v234_v58 }
  0xf3   : > { %v292_v3 = vsel %vm291_vm7, %v290_v56, %v285_v59 }
  0xf4   : > { %v297_v62 = vrot.slane %v241_v60, %v296_v54  ;;  %v304_v63 = vrot.slane %v242_v61, %v303_v55 }
  0xf6   : > { %v299_v4 = vsel %vm298_vm8, %v297_v62, %v292_v3 }
  0xf7   : > { %v306_v6 = vsel %vm305_vm9, %v304_v63, %v299_v4 }
  0xf8   : > { %648 = vmatmul.mubr.msk.f32.vlgmr.msra.gmra.mrb[0].mxu0 %vm307_vm1, %v306_v6 }
 0x1cb   : > { %v379_v10 = vpop.f32.mrb[0].mxu0 }
 0x1cc   : > { %v383_v11 = vmax.f32 %v379_v10, 0.0  ;;  %v649_v14 = vpop.f32.mrb[1].mxu0 }
 0x1ce   : > { %653 = vmatmul.mubr.msk.f32.vlgmr.msra.gmra.mrb[0].mxu1 %vm385_vm11, %v383_v11 }
 0x2a1   : > { %v459_v15 = vpop.f32.mrb[0].mxu1 }
 0x2a2   : > { %v633_v16 = vmul.f32 -2.0, %v459_v15  ;;  %v654_v17 = vpop.f32.mrb[1].mxu1 }
 0x2a4   : > { %v465_v18 = vmul.f32 1.442695, %v633_v16 }
 0x2a6   : > { %718 = vpow2.f32 %v465_v18 }
 0x2b0   : > { %v719_v19 = vpop.eup %718 }
 0x2b1   : > { %v467_v21 = vadd.f32 1.0, %v719_v19 }
 0x2b3   : > { %720 = vrcp.f32 %v467_v21 }
 0x2bd   : > { %v721_v23 = vpop.eup %720 }
 0x2be   : > { %v473_v24 = vrot.slane %v721_v23, %v472_v22 }
 0x2c0   : > { %479 = vbcast.lane.b32.xlu1 %v473_v24, 264  ;;  %475 = vbcast.lane.b32.xlu0 %v473_v24, 256 }
 0x2c4   : > { %483 = vbcast.lane.b32.xlu1 %v473_v24, 272  ;;  %491 = vbcast.lane.b32.xlu0 %v473_v24, 288 }
 0x2c8   : > { %487 = vbcast.lane.b32.xlu1 %v473_v24, 280  ;;  %499 = vbcast.lane.b32.xlu0 %v473_v24, 304 }
 0x2cc   : > { %495 = vbcast.lane.b32.xlu1 %v473_v24, 296 }
 0x2d0   : > { %503 = vbcast.lane.b32.xlu1 %v473_v24, 312 }
 0x332   : > { %v480_v25 = vpop.permute.xlu1 %479  ;;  %v476_v26 = vpop.permute.xlu0 %475 }
 0x333   : > { %v506_v27 = vmul.f32 %v480_v25, %v1035_v2  ;;  %v505_v28 = vmul.f32 %v476_v26, %v1031_v0 }
 0x335   : > { %514 = vst.msk [vmem:[%s201_s4 + $0x8] sm:$0xff] %vm210_vm0, %v506_v27  ;;  %513 = vst.msk [vmem:[%s201_s4] sm:$0xff] %vm210_vm0, %v505_v28 }
 0x336   : > { %v484_v20 = vpop.permute.xlu1 %483  ;;  %v492_v29 = vpop.permute.xlu0 %491 }
 0x337   : > { %v507_v30 = vmul.f32 %v484_v20, %v1033_v1  ;;  %v509_v31 = vmul.f32 %v492_v29, %v1047_v8 }
 0x339   : > { %515 = vst.msk [vmem:[%s201_s4 + $0x10] sm:$0xff] %vm210_vm0, %v507_v30  ;;  %517 = vst.msk [vmem:[%s201_s4 + $0x20] sm:$0xff] %vm210_vm0, %v509_v31 }
 0x33a   : > { %v488_v2 = vpop.permute.xlu1 %487  ;;  %v500_v0 = vpop.permute.xlu0 %499 }
 0x33b   : > { %v508_v32 = vmul.f32 %v488_v2, %v1041_v5  ;;  %v511_v33 = vmul.f32 %v500_v0, %v1055_v12 }
 0x33d   : > { %516 = vst.msk [vmem:[%s201_s4 + $0x18] sm:$0xff] %vm210_vm0, %v508_v32  ;;  %519 = vst.msk [vmem:[%s201_s4 + $0x30] sm:$0xff] %vm210_vm0, %v511_v33 }
 0x33e   : > { %v496_v34 = vpop.permute.xlu1 %495 }
 0x33f   : > { %v510_v1 = vmul.f32 %v496_v34, %v1049_v9 }
 0x341   : > { %518 = vst.msk [vmem:[%s201_s4 + $0x28] sm:$0xff] %vm210_vm0, %v510_v1 }
 0x342   : > { %v504_v8 = vpop.permute.xlu1 %503 }
 0x343   : > { %v512_v5 = vmul.f32 %v504_v8, %v1057_v13 }
 0x345   : > { %520 = vst.msk [vmem:[%s201_s4 + $0x38] sm:$0xff] %vm210_vm0, %v512_v5 }
 0x346   : > { %793 = shalt.err (!%p790_p13)
}
 0x347   : > { %s794_s8 = scalar_lea.hbm %s1099_s20, 1024  ;;  %s798_s5 = scalar_lea.hbm %s1150_s3, 2048 }
 0x348   : > { %p795_p7 = scmp.ne.s32.totalorder %s1099_s20, %s794_s8  ;;  %p799_p1 = scmp.lt.u32.totalorder %s1099_s20, %s1150_s3 }
 0x349   : > { %p800_p11 = scmp.lt.u32.totalorder %s798_s5, %s794_s8  ;;  %p802_p9 = scmp.lt.u32.totalorder %s794_s8, %s1099_s20 }
 0x34a   : > { %p796_p3 = pnand %p795_p7, %p1169_p10 }
 0x34b   : > { %p801_p8 = por %p800_p11, %p799_p1 }
 0x34c   : > { %p797_p12 = pneg %p796_p3 }
 0x34d   : > { %p803_p2 = por %p802_p9, %p801_p8 }
 0x34f   : > { %p804_p4 = pnand %p803_p2, %p797_p12 }
 0x351   : > { %807 = shalt.err (!%p804_p4)
}
 0x352   : > { %s859_s26 = smov 128   ;;  %s860_s4 = smov 8  }
 0x353   : > { %661 = dma.vmem_to_hbm [thread:$0]  (%p1169_p10), %s1101_s10, 1024, %s1099_s20, %s522_s30, %s859_s26, %s859_s26, %s860_s4  }
 0x354 PF: > { %s550_s7 = sand.u32 1, %s838_s12   ;;  %p1170_p5 = scmp.ne.s32.totalorder %s1159_s25, 0 }
 0x355   : > { %p1171_p0 = scmp.ge.s32.totalorder %s850_s15, 2  ;;  %s551_s29 = scalar_lea.sflag [#allocation4], %s550_s7 }
 0x357   : > { %p672_p6 = pnand %p1171_p0, %p1170_p5 }
 0x359   : > { %833 = dma.done.wait (!%p672_p6), %s551_s29, 1024  }
 0x35a   : > { %835 = vsyncadd (!%p672_p6), %s551_s29, 4294966272  ;;  %p17_p13 = scmp.ge.s32.totalorder %s906_s18, 4   ;;  %s1172_s12 = smov %s842_s13 }
 0x35b   : > { %s1173_s13 = smov %s846_s14  ;;  %s1174_s14 = smov %s918_s21 }
 0x35c   : > { %s1175_s15 = smov %s906_s18  ;;  %19 = sbr.rel (!%p17_p13) target bundleno = 6 (0x6), region = 81 }
 0x363   :  { %556 = vsyncpa [#allocation3], 1 }
 0x364   :  { %558 = vsyncpa [#allocation3 + $0x1], 1 }
 0x365   :  { %559 = vsyncpa [#allocation6], 1 }
 0x366   :  { %560 = vsyncpa [#allocation4], 1 }
 0x367   :  { %562 = vsyncpa [#allocation4 + $0x1], 1 }

</bundles_post_ra>
